<compile_context>
chip_gen: v7x
topology: tpu7x:2x2x1
jax: 0.10.0
libtpu: 0.0.40
codegen_flags: <defaults>
</compile_context>

<pallas_src>
import jax
import jax.numpy as jnp
from jax.experimental import pallas as pl
from jax.experimental.pallas import tpu as pltpu


def ae_kernel(x_ref, we_ref, be_ref, wd_ref, bd_ref, o_ref):
    # x_ref:  [TB, D]   native-dtype flattened input tile (pipelined)
    # we_ref: [D, HID]  bf16 encoder weight   (resident across grid)
    # be_ref: [1, HID]  f32  encoder bias     (resident)
    # wd_ref: [HID, D]  bf16 decoder weight   (resident)
    # bd_ref: [1, D]    f32  decoder bias     (resident)
    # o_ref:  [TB, D]   output tile (input dtype); partial tail block is masked
    x = x_ref[...].astype(we_ref.dtype)  # in-kernel bf16 cast (VPU; saves an HBM round-trip)

    # encoder: bf16 MXU matmul, f32 accumulate; bias + ReLU kept in f32
    enc = jnp.dot(x, we_ref[...], preferred_element_type=jnp.float32)
    enc = jnp.maximum(enc + be_ref[...], 0.0)

    # decoder: downcast the small (TB, HID) intermediate for the bf16 MXU path
    dec = jnp.dot(enc.astype(wd_ref.dtype), wd_ref[...],
                  preferred_element_type=jnp.float32) + bd_ref[...]

    o_ref[...] = dec.astype(o_ref.dtype)


def _round_up(x, m):
    return ((x + m - 1) // m) * m


def _choose_batch_tile(B, cap=512):
    # Multiple of 16 (bf16 sublane packing); aim for >= 2 grid steps when
    # B > 16 so the "parallel" batch axis shards across both v7x TensorCores.
    tb = min(cap, _round_up(pl.cdiv(B, 2), 16))
    return max(tb, 16)


def ae_network_forward(x_nchw, w_enc, b_enc, w_dec, b_dec,
                       compute_dtype=jnp.bfloat16):
    """Forward pass of AENetwork: decoder(encoder(x)). Returns NCHW tensor."""
    B, C, H, W = x_nchw.shape
    D = C * H * W
    HID = w_enc.shape[1]
    # Keep output last dim lane-dense (multiple of 128). D = C*H*W = 1024 here.
    assert D % 128 == 0, "pad D to a multiple of 128 in the wrapper"

    TB = _choose_batch_tile(B)
    grid = (pl.cdiv(B, TB),)          # partial last block handled by masked stores

    x_flat = x_nchw.reshape(B, D)     # PyTorch-style NCHW flatten, native dtype

    # Weights: cast only if not already pre-cast at parameter init (no-op then).
    we_c = w_enc if w_enc.dtype == compute_dtype else w_enc.astype(compute_dtype)
    wd_c = w_dec if w_dec.dtype == compute_dtype else w_dec.astype(compute_dtype)
    be2 = b_enc.reshape(1, HID).astype(jnp.float32)
    bd2 = b_dec.reshape(1, D).astype(jnp.float32)

    out_dtype = x_nchw.dtype
    xbytes = jnp.dtype(x_nchw.dtype).itemsize
    cbytes = jnp.dtype(compute_dtype).itemsize
    obytes = jnp.dtype(out_dtype).itemsize
    cost = pl.CostEstimate(
        flops=4 * B * D * HID,                        # two matmuls
        transcendentals=0,
        bytes_accessed=int(
            B * D * xbytes                            # x in (native dtype)
            + D * HID * cbytes + HID * 4              # encoder weight + bias
            + HID * D * cbytes + D * 4                # decoder weight + bias
            + B * D * obytes                          # out
        ),
    )

    out_flat = pl.pallas_call(
        ae_kernel,
        out_shape=jax.ShapeDtypeStruct((B, D), out_dtype),
        grid_spec=pltpu.PrefetchScalarGridSpec(
            num_scalar_prefetch=0,
            grid=grid,
            in_specs=[
                pl.BlockSpec((TB, D), lambda i: (i, 0)),     # x tile (pipelined)
                pl.BlockSpec((D, HID), lambda i: (0, 0)),    # enc weight (resident)
                pl.BlockSpec((1, HID), lambda i: (0, 0)),    # enc bias   (resident)
                pl.BlockSpec((HID, D), lambda i: (0, 0)),    # dec weight (resident)
                pl.BlockSpec((1, D), lambda i: (0, 0)),      # dec bias   (resident)
            ],
            out_specs=pl.BlockSpec((TB, D), lambda i: (i, 0)),
        ),
        compiler_params=pltpu.CompilerParams(
            dimension_semantics=("parallel",),               # megacore on v7x
            vmem_limit_bytes=32 * 1024 * 1024,               # fits all gens at TB=512
        ),
        cost_estimate=cost,
    )(x_flat, we_c, be2, wd_c, bd2)

    return out_flat.reshape(B, C, H, W)


def _reference_forward(x_nchw, w_enc, b_enc, w_dec, b_dec):
    """Reference with the same bf16 rounding of operands as the kernel."""
    B = x_nchw.shape[0]
    xf = x_nchw.reshape(B, -1).astype(jnp.bfloat16).astype(jnp.float32)
    we = w_enc.astype(jnp.bfloat16).astype(jnp.float32)
    wd = w_dec.astype(jnp.bfloat16).astype(jnp.float32)
    enc = jnp.maximum(jnp.dot(xf, we, preferred_element_type=jnp.float32) + b_enc, 0.0)
    enc = enc.astype(jnp.bfloat16).astype(jnp.float32)
    dec = jnp.dot(enc, wd, preferred_element_type=jnp.float32) + b_dec
    return dec.astype(x_nchw.dtype).reshape(x_nchw.shape)


if __name__ == "__main__":
    key = jax.random.PRNGKey(0)
    k_x, k_we, k_be, k_wd, k_bd = jax.random.split(key, 5)

    # Small shapes consistent with an image autoencoder forward.
    B, C, H, W = 2, 4, 16, 16
    D = C * H * W          # 1024 flattened features
    HID = 32               # latent dim

    x = jax.random.normal(k_x, (B, C, H, W), dtype=jnp.float32)

    # Deterministic synthetic parameters (nn.Linear-style fan-in scaling).
    w_enc = jax.random.normal(k_we, (D, HID), dtype=jnp.float32) * (1.0 / D) ** 0.5
    b_enc = jax.random.normal(k_be, (HID,), dtype=jnp.float32) * 0.01
    w_dec = jax.random.normal(k_wd, (HID, D), dtype=jnp.float32) * (1.0 / HID) ** 0.5
    b_dec = jax.random.normal(k_bd, (D,), dtype=jnp.float32) * 0.01

    # Pre-cast weights once (parameter-init time) so no per-call convert op.
    w_enc_c = w_enc.astype(jnp.bfloat16)
    w_dec_c = w_dec.astype(jnp.bfloat16)

    out = ae_network_forward(x, w_enc_c, b_enc, w_dec_c, b_dec)
    out = jax.block_until_ready(out)

    ref = _reference_forward(x, w_enc, b_enc, w_dec, b_dec)
    assert out.shape == (B, C, H, W)
    assert jnp.allclose(out, ref, atol=1e-2, rtol=1e-2), "mismatch vs reference"

    print("KERNEL_OK")
</pallas_src>

<mosaic_0001>
module attributes {stable_mosaic.version = 11 : i64} {
  func.func @ae_kernel(%arg0: i32, %arg1: memref<16x1024xf32, #tpu.memory_space<vmem>>, %arg2: memref<1024x32xbf16, #tpu.memory_space<vmem>>, %arg3: memref<1x32xf32, #tpu.memory_space<vmem>>, %arg4: memref<32x1024xbf16, #tpu.memory_space<vmem>>, %arg5: memref<1x1024xf32, #tpu.memory_space<vmem>>, %arg6: memref<16x1024xf32, #tpu.memory_space<vmem>>) attributes {dimension_semantics = [#tpu.dimension_semantics<parallel>], iteration_bounds = array<i64: 1>, scalar_prefetch = 0 : i64, scratch_operands = 0 : i64, tpu.core_type = #tpu.core_type<tc>, window_params = [{transform_indices = @transform_0, window_bounds = array<i64: 16, 1024>}, {pipeline_mode = #tpu.pipeline_mode<synchronous>, transform_indices = @transform_1, window_bounds = array<i64: 1024, 32>}, {pipeline_mode = #tpu.pipeline_mode<synchronous>, transform_indices = @transform_2, window_bounds = array<i64: 1, 32>}, {pipeline_mode = #tpu.pipeline_mode<synchronous>, transform_indices = @transform_3, window_bounds = array<i64: 32, 1024>}, {pipeline_mode = #tpu.pipeline_mode<synchronous>, transform_indices = @transform_4, window_bounds = array<i64: 1, 1024>}, {transform_indices = @transform_5, window_bounds = array<i64: 16, 1024>}]} {
    %c0 = arith.constant 0 : index
    %c0_0 = arith.constant 0 : index
    %0 = vector.load %arg1[%c0, %c0_0] : memref<16x1024xf32, #tpu.memory_space<vmem>>, vector<16x1024xf32>
    %1 = arith.truncf %0 : vector<16x1024xf32> to vector<16x1024xbf16>
    %c0_1 = arith.constant 0 : index
    %c0_2 = arith.constant 0 : index
    %2 = vector.load %arg2[%c0_1, %c0_2] : memref<1024x32xbf16, #tpu.memory_space<vmem>>, vector<1024x32xbf16>
    %cst = arith.constant dense<0.000000e+00> : vector<16x32xf32>
    %3 = tpu.matmul %1, %2, %cst {dimension_numbers = #tpu.dot_dimension_numbers<[1], [0], [0], [1], [0, 0, 1, 1], [], []>} : vector<16x1024xbf16>, vector<1024x32xbf16>, vector<16x32xf32> -> vector<16x32xf32>
    %c0_3 = arith.constant 0 : index
    %c0_4 = arith.constant 0 : index
    %4 = vector.load %arg3[%c0_3, %c0_4] : memref<1x32xf32, #tpu.memory_space<vmem>>, vector<1x32xf32>
    %5 = vector.broadcast %4 : vector<1x32xf32> to vector<16x32xf32>
    %6 = arith.addf %3, %5 : vector<16x32xf32>
    %cst_5 = arith.constant 0.000000e+00 : f32
    %7 = vector.broadcast %cst_5 : f32 to vector<16x32xf32>
    %8 = arith.maximumf %6, %7 : vector<16x32xf32>
    %9 = arith.truncf %8 : vector<16x32xf32> to vector<16x32xbf16>
    %c0_6 = arith.constant 0 : index
    %c0_7 = arith.constant 0 : index
    %10 = vector.load %arg4[%c0_6, %c0_7] : memref<32x1024xbf16, #tpu.memory_space<vmem>>, vector<32x1024xbf16>
    %cst_8 = arith.constant dense<0.000000e+00> : vector<16x1024xf32>
    %11 = tpu.matmul %9, %10, %cst_8 {dimension_numbers = #tpu.dot_dimension_numbers<[1], [0], [0], [1], [0, 0, 1, 1], [], []>} : vector<16x32xbf16>, vector<32x1024xbf16>, vector<16x1024xf32> -> vector<16x1024xf32>
    %c0_9 = arith.constant 0 : index
    %c0_10 = arith.constant 0 : index
    %12 = vector.load %arg5[%c0_9, %c0_10] : memref<1x1024xf32, #tpu.memory_space<vmem>>, vector<1x1024xf32>
    %13 = vector.broadcast %12 : vector<1x1024xf32> to vector<16x1024xf32>
    %14 = arith.addf %11, %13 : vector<16x1024xf32>
    %c0_11 = arith.constant 0 : index
    %c0_12 = arith.constant 0 : index
    %15 = vector.load %arg6[%c0_11, %c0_12] : memref<16x1024xf32, #tpu.memory_space<vmem>>, vector<16x1024xf32>
    tpu.vector_store %arg6[%c0_11, %c0_12], %14 {strides = array<i32>} : memref<16x1024xf32, #tpu.memory_space<vmem>>, vector<16x1024xf32>,
    return
  }
  func.func @transform_0(%arg0: i32) -> (i32, i32) {
    %c0_i32 = arith.constant 0 : i32
    %c0_i32_0 = arith.constant 0 : i32
    return %arg0, %c0_i32 : i32, i32
  }
  func.func @transform_1(%arg0: i32) -> (i32, i32) {
    %c0_i32 = arith.constant 0 : i32
    %c0_i32_0 = arith.constant 0 : i32
    %c0_i32_1 = arith.constant 0 : i32
    return %c0_i32, %c0_i32_0 : i32, i32
  }
  func.func @transform_2(%arg0: i32) -> (i32, i32) {
    %c0_i32 = arith.constant 0 : i32
    %c0_i32_0 = arith.constant 0 : i32
    %c0_i32_1 = arith.constant 0 : i32
    return %c0_i32, %c0_i32_0 : i32, i32
  }
  func.func @transform_3(%arg0: i32) -> (i32, i32) {
    %c0_i32 = arith.constant 0 : i32
    %c0_i32_0 = arith.constant 0 : i32
    %c0_i32_1 = arith.constant 0 : i32
    return %c0_i32, %c0_i32_0 : i32, i32
  }
  func.func @transform_4(%arg0: i32) -> (i32, i32) {
    %c0_i32 = arith.constant 0 : i32
    %c0_i32_0 = arith.constant 0 : i32
    %c0_i32_1 = arith.constant 0 : i32
    return %c0_i32, %c0_i32_0 : i32, i32
  }
  func.func @transform_5(%arg0: i32) -> (i32, i32) {
    %c0_i32 = arith.constant 0 : i32
    %c0_i32_0 = arith.constant 0 : i32
    return %arg0, %c0_i32 : i32, i32
  }
}

</mosaic_0001>

<bundles_post_ra>
// kernel: tpu_custom_call.1
= control target key start
LH: loop header
LB: loop body
LE: loop exit
PB: predicated region body
PF: predicated region fallthrough
CT: control target
= control target key end

     0   :  { %10 = vsyncpa [#allocation3], 0  ;;  %v61_v29 = vlaneseq  ;;  %v1720_v33 = vmov 1983009808   ;;  %vm1046_vm0 = vcmask 261120   ;;  %s2110_s0 = inlined_call_operand.vmem [shape: f32[2,1024], index: 0, kind: input, shape index: {}]   ;;  %s2111_s1 = inlined_call_operand.vmem [shape: bf16[1024,32], index: 1, kind: input, shape index: {}]   ;;  %s2112_s2 = inlined_call_operand.vmem [shape: f32[1,32], index: 2, kind: input, shape index: {}]   ;;  %s2113_s3 = inlined_call_operand.vmem [shape: bf16[32,1024], index: 3, kind: input, shape index: {}]   ;;  %s2114_s4 = inlined_call_operand.vmem [shape: f32[1,1024], index: 4, kind: input, shape index: {}]   ;;  %s2115_s5 = inlined_call_operand.hbm [shape: f32[2,1024], index: 5, kind: output, shape index: {}]  }
   0x1   :  { %v1608_v0 = vld [vmem:[%s2111_s1 + $0x40] sm:$0xff]   ;;  %v1612_v4 = vld [vmem:[%s2111_s1 + $0x48] sm:$0xff]   ;;  %v1616_v8 = vld [vmem:[%s2111_s1 + $0x50] sm:$0xff]   ;;  %v59_v34 = vunpack.c.l.s4 %v1720_v33 }
   0x2   :  { %v1609_v1 = vld [vmem:[%s2111_s1 + $0xc0] sm:$0xff]   ;;  %1515 = vmatprep.subr.bf16.mxu0 %v1608_v0  ;;  %v1613_v5 = vld [vmem:[%s2111_s1 + $0xc8] sm:$0xff]   ;;  %v1617_v9 = vld [vmem:[%s2111_s1 + $0xd0] sm:$0xff]   ;;  %v1851_v35 = vshrl.u32 %v61_v29, 7 }
   0x3   :  { %v1610_v2 = vld [vmem:[%s2111_s1] sm:$0xff]   ;;  %1537 = vmatprep.subr.bf16.mxu1 %v1609_v1  ;;  %v1614_v6 = vld [vmem:[%s2111_s1 + $0x8] sm:$0xff]   ;;  %v1618_v10 = vld [vmem:[%s2111_s1 + $0x10] sm:$0xff]   ;;  %v60_v38 = vunpack.c.0.s8 %v59_v34 }
   0x4   :  { %v1611_v3 = vld [vmem:[%s2111_s1 + $0x80] sm:$0xff]   ;;  %1516 = vmatpush3.bf16.msra.mxu0 %v1610_v2  ;;  %v1615_v7 = vld [vmem:[%s2111_s1 + $0x88] sm:$0xff]   ;;  %v1619_v11 = vld [vmem:[%s2111_s1 + $0x90] sm:$0xff]  }
   0x5   :  { %1538 = vmatpush3.bf16.msra.mxu1 %v1611_v3  ;;  %1517 = vmatprep.subr.bf16.mxu0 %v1612_v4  ;;  %v1620_v12 = vld [vmem:[%s2111_s1 + $0x58] sm:$0xff]   ;;  %v1624_v16 = vld [vmem:[%s2111_s1 + $0x60] sm:$0xff]   ;;  %v1628_v20 = vld [vmem:[%s2111_s1 + $0x68] sm:$0xff]   ;;  %v1872_v43 = vsub.s32 %v60_v38, %v1851_v35 }
   0x6   :  { %1539 = vmatprep.subr.bf16.mxu1 %v1613_v5  ;;  %v1621_v13 = vld [vmem:[%s2111_s1 + $0xd8] sm:$0xff]   ;;  %v1625_v17 = vld [vmem:[%s2111_s1 + $0xe0] sm:$0xff]   ;;  %v1629_v21 = vld [vmem:[%s2111_s1 + $0xe8] sm:$0xff]  }
   0x7   :  { %v1622_v14 = vld [vmem:[%s2111_s1 + $0x18] sm:$0xff]   ;;  %v1626_v18 = vld [vmem:[%s2111_s1 + $0x20] sm:$0xff]   ;;  %v1630_v22 = vld [vmem:[%s2111_s1 + $0x28] sm:$0xff]  }
   0x8   :  { %1518 = vmatpush3.bf16.msra.mxu0 %v1614_v6  ;;  %v1623_v15 = vld [vmem:[%s2111_s1 + $0x98] sm:$0xff]   ;;  %v1627_v19 = vld [vmem:[%s2111_s1 + $0xa0] sm:$0xff]   ;;  %v1631_v23 = vld [vmem:[%s2111_s1 + $0xa8] sm:$0xff]  }
   0x9   :  { %1540 = vmatpush3.bf16.msra.mxu1 %v1615_v7  ;;  %1519 = vmatprep.subr.bf16.mxu0 %v1616_v8  ;;  %v1632_v24 = vld [vmem:[%s2111_s1 + $0x70] sm:$0xff]   ;;  %v1636_v28 = vld [vmem:[%s2111_s1 + $0x78] sm:$0xff]   ;;  %v1652_v46 = vld [vmem:[%s2111_s1 + $0x140] sm:$0xff]  }
   0xa   :  { %1541 = vmatprep.subr.bf16.mxu1 %v1617_v9  ;;  %v1633_v25 = vld [vmem:[%s2111_s1 + $0xf0] sm:$0xff]   ;;  %v1637_v30 = vld [vmem:[%s2111_s1 + $0xf8] sm:$0xff]   ;;  %v1653_v51 = vld [vmem:[%s2111_s1 + $0x1c0] sm:$0xff]  }
   0xb   :  { %v1634_v26 = vld [vmem:[%s2111_s1 + $0x30] sm:$0xff]   ;;  %v1638_v31 = vld [vmem:[%s2111_s1 + $0x38] sm:$0xff]   ;;  %v1654_v60 = vld [vmem:[%s2111_s1 + $0x100] sm:$0xff]  }
   0xc   :  { %1520 = vmatpush3.bf16.msra.mxu0 %v1618_v10  ;;  %v1635_v27 = vld [vmem:[%s2111_s1 + $0xb0] sm:$0xff]   ;;  %v1639_v32 = vld [vmem:[%s2111_s1 + $0xb8] sm:$0xff]   ;;  %v1655_v1 = vld [vmem:[%s2111_s1 + $0x180] sm:$0xff]  }
   0xd   :  { %1542 = vmatpush3.bf16.msra.mxu1 %v1619_v11  ;;  %1521 = vmatprep.subr.bf16.mxu0 %v1620_v12  ;;  %v1640_v36 = vld [vmem:[%s2110_s0] ss:$16 sps:$4 sm:$0xff]   ;;  %v1648_v41 = vld [vmem:[%s2110_s0 + $0x4] ss:$16 sps:$4 sm:$0xff]   ;;  %v1656_v4 = vld [vmem:[%s2111_s1 + $0x148] sm:$0xff]  }
   0xe   :  { %1543 = vmatprep.subr.bf16.mxu1 %v1621_v13  ;;  %v1642_v37 = vld [vmem:[%s2110_s0 + $0x20] ss:$16 sps:$4 sm:$0xff]   ;;  %v1649_v42 = vld [vmem:[%s2110_s0 + $0x24] ss:$16 sps:$4 sm:$0xff]   ;;  %v64_v47 = vrot.slane %v1640_v36, %v1872_v43  ;;  %v71_v52 = vrot.slane %v1648_v41, %v1872_v43  ;;  %v1657_v7 = vld [vmem:[%s2111_s1 + $0x1c8] sm:$0xff]  }
   0xf   :  { %v1644_v39 = vld [vmem:[%s2110_s0 + $0x40] ss:$16 sps:$4 sm:$0xff]   ;;  %v1650_v44 = vld [vmem:[%s2110_s0 + $0x44] ss:$16 sps:$4 sm:$0xff]   ;;  %v78_v48 = vrot.slane %v1642_v37, %v1872_v43  ;;  %v85_v53 = vrot.slane %v1649_v42, %v1872_v43  ;;  %v1658_v8 = vld [vmem:[%s2111_s1 + $0x108] sm:$0xff]  }
  0x10   :  { %1522 = vmatpush3.bf16.msra.mxu0 %v1622_v14  ;;  %v1646_v40 = vld [vmem:[%s2110_s0 + $0x60] ss:$16 sps:$4 sm:$0xff]   ;;  %v1651_v45 = vld [vmem:[%s2110_s0 + $0x64] ss:$16 sps:$4 sm:$0xff]   ;;  %v136_v49 = vrot.slane %v1644_v39, %v1872_v43  ;;  %v143_v54 = vrot.slane %v1650_v44, %v1872_v43  ;;  %v1659_v9 = vld [vmem:[%s2111_s1 + $0x188] sm:$0xff]  }
  0x11   :  { %1544 = vmatpush3.bf16.msra.mxu1 %v1623_v15  ;;  %1523 = vmatprep.subr.bf16.mxu0 %v1624_v16  ;;  %v150_v50 = vrot.slane %v1646_v40, %v1872_v43  ;;  %v157_v55 = vrot.slane %v1651_v45, %v1872_v43  ;;  %v87_v56 = vcombine.high %v64_v47, %v78_v48  ;;  %v1660_v10 = vld [vmem:[%s2111_s1 + $0x150] sm:$0xff]   ;;  %v1664_v14 = vld [vmem:[%s2111_s1 + $0x158] sm:$0xff]  }
  0x12   :  { %1545 = vmatprep.subr.bf16.mxu1 %v1625_v17  ;;  %v86_v58 = vcombine.low %v64_v47, %v78_v48  ;;  %v89_v61 = vcombine.high %v71_v52, %v85_v53  ;;  %v88_v63 = vcombine.low %v71_v52, %v85_v53  ;;  %v1661_v11 = vld [vmem:[%s2111_s1 + $0x1d0] sm:$0xff]   ;;  %v1665_v15 = vld [vmem:[%s2111_s1 + $0x1d8] sm:$0xff]  }
  0x13   :  { %v159_v57 = vcombine.high %v136_v49, %v150_v50  ;;  %v158_v59 = vcombine.low %v136_v49, %v150_v50  ;;  %v161_v62 = vcombine.high %v143_v54, %v157_v55  ;;  %v160_v0 = vcombine.low %v143_v54, %v157_v55  ;;  %v1662_v12 = vld [vmem:[%s2111_s1 + $0x110] sm:$0xff]   ;;  %v1666_v16 = vld [vmem:[%s2111_s1 + $0x118] sm:$0xff]  }
  0x14   :  { %1524 = vmatpush3.bf16.msra.mxu0 %v1626_v18  ;;  %v1663_v13 = vld [vmem:[%s2111_s1 + $0x190] sm:$0xff]   ;;  %v1667_v17 = vld [vmem:[%s2111_s1 + $0x198] sm:$0xff]   ;;  %v1668_v18 = vld [vmem:[%s2111_s1 + $0x160] sm:$0xff]  }
  0x15   :  { %1546 = vmatpush3.bf16.msra.mxu1 %v1627_v19  ;;  %1525 = vmatprep.subr.bf16.mxu0 %v1628_v20  ;;  %v215_v2 = vpack.c.bf16 %v159_v57, %v87_v56  ;;  %v214_v3 = vpack.c.bf16 %v158_v59, %v86_v58  ;;  %v217_v5 = vpack.c.bf16 %v161_v62, %v89_v61  ;;  %v1669_v19 = vld [vmem:[%s2111_s1 + $0x1e0] sm:$0xff]   ;;  %v1679_v29 = vld [vmem:[%s2111_s1 + $0x1b0] sm:$0xff]   ;;  %v1683_v33 = vld [vmem:[%s2111_s1 + $0x1b8] sm:$0xff]  }
  0x16   :  { %1547 = vmatprep.subr.bf16.mxu1 %v1629_v21  ;;  %v216_v6 = vpack.c.bf16 %v160_v0, %v88_v63  ;;  %v1670_v20 = vld [vmem:[%s2111_s1 + $0x120] sm:$0xff]   ;;  %v1684_v34 = vld [vmem:[%s2110_s0 + $0x8] ss:$16 sps:$4 sm:$0xff]   ;;  %v1692_v39 = vld [vmem:[%s2110_s0 + $0xc] ss:$16 sps:$4 sm:$0xff]  }
  0x17   :  { %773 = vmatprep.mubr.bf16.mxu0 %v215_v2  ;;  %814 = vmatprep.mubr.bf16.mxu1 %v217_v5  ;;  %v1671_v21 = vld [vmem:[%s2111_s1 + $0x1a0] sm:$0xff]   ;;  %v1686_v36 = vld [vmem:[%s2110_s0 + $0x28] ss:$16 sps:$4 sm:$0xff]   ;;  %v100_v40 = vrot.slane %v1684_v34, %v1872_v43  ;;  %v1693_v42 = vld [vmem:[%s2110_s0 + $0x2c] ss:$16 sps:$4 sm:$0xff]   ;;  %v107_v48 = vrot.slane %v1692_v39, %v1872_v43 }
  0x18   :  { %1526 = vmatpush3.bf16.msra.mxu0 %v1630_v22  ;;  %v1672_v22 = vld [vmem:[%s2111_s1 + $0x168] sm:$0xff]   ;;  %v114_v41 = vrot.slane %v1686_v36, %v1872_v43  ;;  %v121_v50 = vrot.slane %v1693_v42, %v1872_v43  ;;  %v908_v0 = vld [vmem:[%s2113_s3] sm:$0xff] }
  0x19   :  { %1548 = vmatpush3.bf16.msra.mxu1 %v1631_v23  ;;  %1527 = vmatprep.subr.bf16.mxu0 %v1632_v24  ;;  %v1673_v23 = vld [vmem:[%s2111_s1 + $0x1e8] sm:$0xff]  }
  0x1a   :  { %1549 = vmatprep.subr.bf16.mxu1 %v1633_v25  ;;  %v1674_v24 = vld [vmem:[%s2111_s1 + $0x128] sm:$0xff]   ;;  %v123_v49 = vcombine.high %v100_v40, %v114_v41  ;;  %v122_v54 = vcombine.low %v100_v40, %v114_v41  ;;  %v125_v56 = vcombine.high %v107_v48, %v121_v50  ;;  %v124_v58 = vcombine.low %v107_v48, %v121_v50 }
  0x1b   :  { %v1675_v25 = vld [vmem:[%s2111_s1 + $0x1a8] sm:$0xff]  }
  0x1c   :  { %1528 = vmatpush3.bf16.msra.mxu0 %v1634_v26  ;;  %v1676_v26 = vld [vmem:[%s2111_s1 + $0x170] sm:$0xff]   ;;  %v1688_v37 = vld [vmem:[%s2110_s0 + $0x48] ss:$16 sps:$4 sm:$0xff]   ;;  %v1694_v44 = vld [vmem:[%s2110_s0 + $0x4c] ss:$16 sps:$4 sm:$0xff]  }
  0x1d   :  { %1550 = vmatpush3.bf16.msra.mxu1 %v1635_v27  ;;  %1529 = vmatprep.subr.bf16.mxu0 %v1636_v28  ;;  %v1677_v27 = vld [vmem:[%s2111_s1 + $0x1f0] sm:$0xff]   ;;  %v1690_v38 = vld [vmem:[%s2110_s0 + $0x68] ss:$16 sps:$4 sm:$0xff]   ;;  %v1695_v45 = vld [vmem:[%s2110_s0 + $0x6c] ss:$16 sps:$4 sm:$0xff]  }
  0x1e   :  { %1551 = vmatprep.subr.bf16.mxu1 %v1637_v30  ;;  %v1678_v28 = vld [vmem:[%s2111_s1 + $0x130] sm:$0xff]   ;;  %v1680_v30 = vld [vmem:[%s2111_s1 + $0x178] sm:$0xff]   ;;  %v186_v47 = vrot.slane %v1690_v38, %v1872_v43  ;;  %v193_v52 = vrot.slane %v1695_v45, %v1872_v43  ;;  %v909_v2 = vld [vmem:[%s2113_s3 + $0x8] sm:$0xff] }
  0x20   :  { %1530 = vmatpush3.bf16.msra.mxu0 %v1638_v31  ;;  %v1681_v31 = vld [vmem:[%s2111_s1 + $0x1f8] sm:$0xff]  }
  0x21   :  { %1552 = vmatpush3.bf16.msra.mxu1 %v1639_v32  ;;  %1559 = vmatprep.subr.bf16.mxu0 %v1652_v46  ;;  %v1682_v32 = vld [vmem:[%s2111_s1 + $0x138] sm:$0xff]   ;;  %v172_v46 = vrot.slane %v1688_v37, %v1872_v43 }
  0x22   :  { %1581 = vmatprep.subr.bf16.mxu1 %v1653_v51  ;;  %v179_v51 = vrot.slane %v1694_v44, %v1872_v43 }
  0x23   :  { %774 = vmatmul.mubr.bf16.vlgmr.msra.gmra.mrb[0].mxu0 %v214_v3  ;;  %v195_v53 = vcombine.high %v172_v46, %v186_v47  ;;  %v194_v55 = vcombine.low %v172_v46, %v186_v47 }
  0x24   :  { %815 = vmatmul.mubr.bf16.vlgmr.msra.gmra.mrb[0].mxu1 %v216_v6  ;;  %1560 = vmatpush3.bf16.msra.mxu0 %v1654_v60  ;;  %v197_v57 = vcombine.high %v179_v51, %v193_v52  ;;  %v196_v59 = vcombine.low %v179_v51, %v193_v52 }
  0x25   :  { %1582 = vmatpush3.bf16.msra.mxu1 %v1655_v1  ;;  %1561 = vmatprep.subr.bf16.mxu0 %v1656_v4  ;;  %v219_v60 = vpack.c.bf16 %v195_v53, %v123_v49  ;;  %v218_v61 = vpack.c.bf16 %v194_v55, %v122_v54  ;;  %v912_v1 = vld [vmem:[%s2113_s3 + $0x20] sm:$0xff]  ;;  %v913_v4 = vld [vmem:[%s2113_s3 + $0x28] sm:$0xff] }
  0x26   :  { %1583 = vmatprep.subr.bf16.mxu1 %v1657_v7  ;;  %v221_v62 = vpack.c.bf16 %v197_v57, %v125_v56  ;;  %v220_v63 = vpack.c.bf16 %v196_v59, %v124_v58  ;;  %v1496_v3 = vcombine.high %v908_v0, %v912_v1  ;;  %v1495_v5 = vcombine.low %v908_v0, %v912_v1 }
  0x27   :  { %855 = vmatprep.mubr.bf16.mxu0 %v219_v60  ;;  %v1497_v6 = vcombine.low %v909_v2, %v913_v4  ;;  %v1498_v7 = vcombine.high %v909_v2, %v913_v4  ;;  %v918_v60 = vld [vmem:[%s2113_s3 + $0x50] sm:$0xff] }
  0x28   :  { %1562 = vmatpush3.bf16.msra.mxu0 %v1658_v8  ;;  %896 = vmatprep.mubr.bf16.mxu1 %v221_v62  ;;  %v916_v8 = vld [vmem:[%s2113_s3 + $0x40] sm:$0xff]  ;;  %v919_v62 = vld [vmem:[%s2113_s3 + $0x58] sm:$0xff] }
  0x29   :  { %1584 = vmatpush3.bf16.msra.mxu1 %v1659_v9  ;;  %1563 = vmatprep.subr.bf16.mxu0 %v1660_v10  ;;  %v920_v9 = vld [vmem:[%s2113_s3 + $0x60] sm:$0xff]  ;;  %v917_v10 = vld [vmem:[%s2113_s3 + $0x48] sm:$0xff] }
  0x2a   :  { %1585 = vmatprep.subr.bf16.mxu1 %v1661_v11  ;;  %v1504_v11 = vcombine.high %v916_v8, %v920_v9 }
  0x2c   :  { %1564 = vmatpush3.bf16.msra.mxu0 %v1662_v12  ;;  %v921_v12 = vld [vmem:[%s2113_s3 + $0x68] sm:$0xff] }
  0x2d   :  { %1586 = vmatpush3.bf16.msra.mxu1 %v1663_v13  ;;  %1565 = vmatprep.subr.bf16.mxu0 %v1664_v14  ;;  %v1503_v13 = vcombine.low %v916_v8, %v920_v9  ;;  %v1505_v14 = vcombine.low %v917_v10, %v921_v12  ;;  %v936_v8 = vsub.s32 2, %v1851_v35  ;;  %v924_v9 = vld [vmem:[%s2114_s4] sm:$0xff] }
  0x2e   :  { %1587 = vmatprep.subr.bf16.mxu1 %v1665_v15  ;;  %v1506_v15 = vcombine.high %v917_v10, %v921_v12  ;;  %v932_v10 = vsub.s32 1, %v1851_v35 }
  0x30   :  { %1566 = vmatpush3.bf16.msra.mxu0 %v1666_v16  ;;  %v910_v16 = vld [vmem:[%s2113_s3 + $0x10] sm:$0xff] }
  0x31   :  { %1588 = vmatpush3.bf16.msra.mxu1 %v1667_v17  ;;  %1567 = vmatprep.subr.bf16.mxu0 %v1668_v18  ;;  %v914_v17 = vld [vmem:[%s2113_s3 + $0x30] sm:$0xff]  ;;  %v911_v18 = vld [vmem:[%s2113_s3 + $0x18] sm:$0xff] }
  0x32   :  { %1589 = vmatprep.subr.bf16.mxu1 %v1669_v19  ;;  %v1721_v19 = vmov 0  }
  0x34   :  { %1568 = vmatpush3.bf16.msra.mxu0 %v1670_v20  ;;  %v1499_v20 = vcombine.low %v910_v16, %v914_v17 }
  0x35   :  { %1590 = vmatpush3.bf16.msra.mxu1 %v1671_v21  ;;  %1569 = vmatprep.subr.bf16.mxu0 %v1672_v22  ;;  %v1500_v21 = vcombine.high %v910_v16, %v914_v17  ;;  %v915_v22 = vld [vmem:[%s2113_s3 + $0x38] sm:$0xff]  ;;  %v944_v16 = vsub.s32 4, %v1851_v35  ;;  %v952_v17 = vsub.s32 6, %v1851_v35 }
  0x36   :  { %1591 = vmatprep.subr.bf16.mxu1 %v1673_v23  ;;  %v1501_v23 = vcombine.low %v911_v18, %v915_v22 }
  0x38   :  { %1570 = vmatpush3.bf16.msra.mxu0 %v1674_v24  ;;  %v1502_v24 = vcombine.high %v911_v18, %v915_v22 }
  0x39   :  { %1592 = vmatpush3.bf16.msra.mxu1 %v1675_v25  ;;  %1571 = vmatprep.subr.bf16.mxu0 %v1676_v26 }
  0x3a   :  { %1593 = vmatprep.subr.bf16.mxu1 %v1677_v27  ;;  %v1430_v27 = vld [vmem:[%s2112_s2] ss:$0 sm:$0xff] }
  0x3c   :  { %1572 = vmatpush3.bf16.msra.mxu0 %v1678_v28 }
  0x3d   :  { %1594 = vmatpush3.bf16.msra.mxu1 %v1679_v29  ;;  %1573 = vmatprep.subr.bf16.mxu0 %v1680_v30 }
  0x3e   :  { %1595 = vmatprep.subr.bf16.mxu1 %v1681_v31 }
  0x40   :  { %1574 = vmatpush3.bf16.msra.mxu0 %v1682_v32 }
  0x41   :  { %1596 = vmatpush3.bf16.msra.mxu1 %v1683_v33  ;;  %1050 = vmatprep.subr.bf16.mxu0 %v1496_v3 }
  0x42   :  { %1093 = vmatprep.subr.bf16.mxu1 %v1498_v7  ;;  %v928_v7 = vsub.s32 0, %v1851_v35 }
  0x43   :  { %856 = vmatmul.mubr.bf16.vlgmr.msra.gmra.mrb[4].mxu0 %v218_v61  ;;  %v922_v61 = vld [vmem:[%s2113_s3 + $0x70] sm:$0xff] }
  0x44   :  { %897 = vmatmul.mubr.bf16.vlgmr.msra.gmra.mrb[4].mxu1 %v220_v63  ;;  %1051 = vmatpush1.bf16.msra.mxu0 %v1495_v5  ;;  %v923_v63 = vld [vmem:[%s2113_s3 + $0x78] sm:$0xff]  ;;  %v1508_v3 = vcombine.high %v918_v60, %v922_v61  ;;  %v1507_v5 = vcombine.low %v918_v60, %v922_v61  ;;  %v929_v12 = vrot.slane %v924_v9, %v928_v7 }
  0x45   :  { %1094 = vmatpush1.bf16.msra.mxu1 %v1497_v6  ;;  %1052 = vmatprep.subr.bf16.mxu0 %v1504_v11  ;;  %v1510_v4 = vcombine.high %v919_v62, %v923_v63  ;;  %v1509_v6 = vcombine.low %v919_v62, %v923_v63  ;;  %v940_v11 = vsub.s32 3, %v1851_v35 }
  0x46   :  { %1095 = vmatprep.subr.bf16.mxu1 %v1506_v15  ;;  %1082 = vmatprep.mubr.bf16.mxu0 %v1721_v19 }
  0x47   :  { %1125 = vmatprep.mubr.bf16.mxu1 %v1721_v19  ;;  %v941_v15 = vrot.slane %v924_v9, %v940_v11 }
  0x48   :  { %1053 = vmatpush1.bf16.msra.mxu0 %v1503_v13  ;;  %v937_v13 = vrot.slane %v924_v9, %v936_v8 }
  0x49   :  { %1096 = vmatpush1.bf16.msra.mxu1 %v1505_v14  ;;  %1136 = vmatprep.subr.bf16.mxu0 %v1500_v21  ;;  %v933_v14 = vrot.slane %v924_v9, %v932_v10 }
  0x4a   :  { %1179 = vmatprep.subr.bf16.mxu1 %v1502_v24  ;;  %v948_v24 = vsub.s32 5, %v1851_v35 }
  0xf6   :  { %v1531_v25 = vpop.f32.mrb[0].mxu0 }
  0xf7   :  { %v1553_v26 = vpop.f32.mrb[0].mxu1  ;;  %v1532_v28 = vpop.f32.mrb[1].mxu0 }
  0xf8   :  { %v1533_v29 = vadd.f32 %v1532_v28, %v1531_v25  ;;  %v1554_v30 = vpop.f32.mrb[1].mxu1  ;;  %v1534_v31 = vpop.f32.mrb[2].mxu0  ;;  %v956_v25 = vsub.s32 7, %v1851_v35 }
  0xf9   :  { %v1555_v32 = vadd.f32 %v1554_v30, %v1553_v26  ;;  %v1556_v33 = vpop.f32.mrb[2].mxu1  ;;  %v1535_v34 = vpop.f32.mrb[3].mxu0 }
  0xfa   :  { %v776_v36 = vadd.f32 %v1533_v29, %v1430_v27  ;;  %v1536_v37 = vadd.f32 %v1535_v34, %v1534_v31  ;;  %v1557_v38 = vpop.f32.mrb[3].mxu1  ;;  %v945_v34 = vrot.slane %v924_v9, %v944_v16 }
  0xfb   :  { %v1558_v39 = vadd.f32 %v1557_v38, %v1556_v33 }
  0xfc   :  { %v817_v40 = vadd.f32 %v1555_v32, %v776_v36  ;;  %v779_v41 = vadd.f32 %v1536_v37, %v1430_v27  ;;  %v953_v36 = vrot.slane %v924_v9, %v952_v17 }
  0xfe   :  { %v820_v42 = vadd.f32 %v1558_v39, %v779_v41 }
 0x116   :  { %v1575_v44 = vpop.f32.mrb[4].mxu0 }
 0x117   :  { %v1597_v45 = vpop.f32.mrb[4].mxu1  ;;  %v1576_v46 = vpop.f32.mrb[5].mxu0 }
 0x118   :  { %v1577_v47 = vadd.f32 %v1576_v46, %v1575_v44  ;;  %v1598_v48 = vpop.f32.mrb[5].mxu1  ;;  %v1578_v49 = vpop.f32.mrb[6].mxu0  ;;  %v949_v44 = vrot.slane %v924_v9, %v948_v24 }
 0x119   :  { %v1599_v50 = vadd.f32 %v1598_v48, %v1597_v45  ;;  %v1600_v51 = vpop.f32.mrb[6].mxu1  ;;  %v1579_v52 = vpop.f32.mrb[7].mxu0  ;;  %v957_v45 = vrot.slane %v924_v9, %v956_v25 }
 0x11a   :  { %v858_v53 = vadd.f32 %v1577_v47, %v817_v40  ;;  %v1580_v54 = vadd.f32 %v1579_v52, %v1578_v49  ;;  %v1601_v55 = vpop.f32.mrb[7].mxu1 }
 0x11b   :  { %v1602_v56 = vadd.f32 %v1601_v55, %v1600_v51 }
 0x11c   :  { %v899_v57 = vadd.f32 %v1599_v50, %v858_v53  ;;  %v861_v58 = vadd.f32 %v1580_v54, %v820_v42 }
 0x11e   :  { %v902_v59 = vadd.f32 %v1602_v56, %v861_v58  ;;  %v905_v0 = vmax.f32 %v899_v57, 0.0 }
 0x120   :  { %v906_v1 = vmax.f32 %v902_v59, 0.0 }
 0x122   :  { %v907_v2 = vpack.c.bf16 %v906_v1, %v905_v0 }
 0x124   :  { %1511 = vmatmul.mubr.msk.bf16.vlgmr.msra.gmra.mrb[8].mxu0 %vm1046_vm0, %v907_v2  ;;  %1512 = vmatmul.mubr.msk.bf16.vlgmr.msra.gmra.mrb[8].mxu1 %vm1046_vm0, %v907_v2 }
 0x125   :  { %1137 = vmatpush1.bf16.msra.mxu0 %v1499_v20  ;;  %1180 = vmatpush1.bf16.msra.mxu1 %v1501_v23 }
 0x126   :  { %1138 = vmatprep.subr.bf16.mxu0 %v1508_v3  ;;  %1181 = vmatprep.subr.bf16.mxu1 %v1510_v4 }
 0x127   :  { %1168 = vmatprep.mubr.bf16.mxu0 %v1721_v19  ;;  %1211 = vmatprep.mubr.bf16.mxu1 %v1721_v19 }
 0x129   :  { %1139 = vmatpush1.bf16.msra.mxu0 %v1507_v5  ;;  %1182 = vmatpush1.bf16.msra.mxu1 %v1509_v6 }
 0x12c   :  { %1513 = vmatmul.mubr.msk.bf16.vlgmr.msra.gmra.mrb[12].mxu0 %vm1046_vm0, %v907_v2  ;;  %1514 = vmatmul.mubr.msk.bf16.vlgmr.msra.gmra.mrb[12].mxu1 %vm1046_vm0, %v907_v2 }
 0x1f7   :  { %v1084_v18 = vpop.f32.mrb[8].mxu0  ;;  %v1127_v19 = vpop.f32.mrb[8].mxu1 }
 0x1f8   :  { %v1085_v20 = vadd.f32 %v1084_v18, %v929_v12  ;;  %v1128_v21 = vadd.f32 %v1127_v19, %v937_v13  ;;  %v1086_v22 = vpop.f32.mrb[9].mxu0  ;;  %v1129_v23 = vpop.f32.mrb[9].mxu1 }
 0x1f9   :  { %v1087_v26 = vadd.f32 %v1086_v22, %v933_v14  ;;  %v1130_v27 = vadd.f32 %v1129_v23, %v941_v15  ;;  %v1088_v28 = vpop.f32.mrb[10].mxu0  ;;  %v1131_v29 = vpop.f32.mrb[10].mxu1 }
 0x1fa   :  { %v1089_v30 = vadd.f32 %v1088_v28, %v929_v12  ;;  %v1132_v31 = vadd.f32 %v1131_v29, %v937_v13  ;;  %v1090_v32 = vpop.f32.mrb[11].mxu0  ;;  %v1133_v33 = vpop.f32.mrb[11].mxu1 }
 0x1fb   :  { %v1238_v37 = vcombine.low %v1085_v20, %v1087_v26  ;;  %v1239_v38 = vcombine.high %v1085_v20, %v1087_v26  ;;  %v1240_v39 = vcombine.low %v1128_v21, %v1130_v27  ;;  %v1241_v40 = vcombine.high %v1128_v21, %v1130_v27 }
 0x1fc   :  { %v1091_v41 = vadd.f32 %v1090_v32, %v933_v14  ;;  %v1134_v42 = vadd.f32 %v1133_v33, %v941_v15 }
 0x1fd   :  { %v1248_v35 = vrot.slane %v1238_v37, %v1872_v43  ;;  %v1255_v46 = vrot.slane %v1239_v38, %v1872_v43  ;;  %v1262_v47 = vrot.slane %v1240_v39, %v1872_v43  ;;  %v1269_v48 = vrot.slane %v1241_v40, %v1872_v43 }
 0x1fe   :  { %v1310_v49 = vcombine.low %v1089_v30, %v1091_v41  ;;  %v1311_v50 = vcombine.high %v1089_v30, %v1091_v41  ;;  %v1312_v51 = vcombine.low %v1132_v31, %v1134_v42  ;;  %v1313_v52 = vcombine.high %v1132_v31, %v1134_v42 }
 0x1ff   :  { %v1270_v53 = vcombine.low %v1248_v35, %v1262_v47  ;;  %v1271_v54 = vcombine.high %v1248_v35, %v1262_v47  ;;  %v1272_v55 = vcombine.low %v1255_v46, %v1269_v48  ;;  %v1273_v56 = vcombine.high %v1255_v46, %v1269_v48  ;;  %v1170_v57 = vpop.f32.mrb[12].mxu0  ;;  %v1213_v58 = vpop.f32.mrb[12].mxu1 }
 0x200   :  { %v1320_v59 = vrot.slane %v1310_v49, %v1872_v43  ;;  %v1327_v60 = vrot.slane %v1311_v50, %v1872_v43  ;;  %v1334_v61 = vrot.slane %v1312_v51, %v1872_v43  ;;  %v1341_v62 = vrot.slane %v1313_v52, %v1872_v43  ;;  %v1172_v63 = vpop.f32.mrb[13].mxu0  ;;  %v1215_v0 = vpop.f32.mrb[13].mxu1 }
 0x201   :  { %1398 = vst [vmem:[#allocation2] sm:$0xff] %v1270_v53  ;;  %1400 = vst [vmem:[#allocation2 + $0x10] sm:$0xff] %v1271_v54  ;;  %v1171_v1 = vadd.f32 %v1170_v57, %v945_v34  ;;  %v1214_v2 = vadd.f32 %v1213_v58, %v953_v36  ;;  %v1173_v3 = vadd.f32 %v1172_v63, %v949_v44  ;;  %v1174_v5 = vpop.f32.mrb[14].mxu0  ;;  %v1217_v6 = vpop.f32.mrb[14].mxu1 }
 0x202   :  { %1402 = vst [vmem:[#allocation2 + $0x20] sm:$0xff] %v1272_v55  ;;  %1404 = vst [vmem:[#allocation2 + $0x30] sm:$0xff] %v1273_v56  ;;  %v1216_v4 = vadd.f32 %v1215_v0, %v957_v45  ;;  %v1342_v7 = vcombine.low %v1320_v59, %v1334_v61  ;;  %v1343_v8 = vcombine.high %v1320_v59, %v1334_v61  ;;  %v1176_v11 = vpop.f32.mrb[15].mxu0  ;;  %v1219_v12 = vpop.f32.mrb[15].mxu1 }
 0x203   :  { %v1344_v9 = vcombine.low %v1327_v60, %v1341_v62  ;;  %v1345_v10 = vcombine.high %v1327_v60, %v1341_v62  ;;  %v1274_v13 = vcombine.low %v1171_v1, %v1173_v3  ;;  %v1275_v14 = vcombine.high %v1171_v1, %v1173_v3 }
 0x204   :  { %v1276_v15 = vcombine.low %v1214_v2, %v1216_v4  ;;  %v1277_v16 = vcombine.high %v1214_v2, %v1216_v4  ;;  %1406 = vst [vmem:[#allocation2 + $0x40] sm:$0xff] %v1342_v7  ;;  %1408 = vst [vmem:[#allocation2 + $0x50] sm:$0xff] %v1343_v8  ;;  %v1175_v17 = vadd.f32 %v1174_v5, %v945_v34 }
 0x205   :  { %1410 = vst [vmem:[#allocation2 + $0x60] sm:$0xff] %v1344_v9  ;;  %1412 = vst [vmem:[#allocation2 + $0x70] sm:$0xff] %v1345_v10  ;;  %v1218_v18 = vadd.f32 %v1217_v6, %v953_v36  ;;  %v1177_v19 = vadd.f32 %v1176_v11, %v949_v44  ;;  %v1220_v20 = vadd.f32 %v1219_v12, %v957_v45 }
 0x206   :  { %v1284_v21 = vrot.slane %v1274_v13, %v1872_v43  ;;  %v1291_v22 = vrot.slane %v1275_v14, %v1872_v43  ;;  %v1298_v23 = vrot.slane %v1276_v15, %v1872_v43  ;;  %v1305_v24 = vrot.slane %v1277_v16, %v1872_v43 }
 0x207   :  { %v1346_v25 = vcombine.low %v1175_v17, %v1177_v19  ;;  %v1347_v26 = vcombine.high %v1175_v17, %v1177_v19  ;;  %v1348_v27 = vcombine.low %v1218_v18, %v1220_v20  ;;  %v1349_v28 = vcombine.high %v1218_v18, %v1220_v20 }
 0x208   :  { %v1306_v29 = vcombine.low %v1284_v21, %v1298_v23  ;;  %v1307_v30 = vcombine.high %v1284_v21, %v1298_v23  ;;  %v1308_v31 = vcombine.low %v1291_v22, %v1305_v24  ;;  %v1309_v32 = vcombine.high %v1291_v22, %v1305_v24 }
 0x209   :  { %v1356_v33 = vrot.slane %v1346_v25, %v1872_v43  ;;  %v1363_v34 = vrot.slane %v1347_v26, %v1872_v43  ;;  %v1370_v36 = vrot.slane %v1348_v27, %v1872_v43  ;;  %v1377_v37 = vrot.slane %v1349_v28, %v1872_v43 }
 0x20a   :  { %1399 = vst [vmem:[#allocation2 + $0x8] sm:$0xff] %v1306_v29  ;;  %1401 = vst [vmem:[#allocation2 + $0x18] sm:$0xff] %v1307_v30 }
 0x20b   :  { %1403 = vst [vmem:[#allocation2 + $0x28] sm:$0xff] %v1308_v31  ;;  %1405 = vst [vmem:[#allocation2 + $0x38] sm:$0xff] %v1309_v32  ;;  %v1378_v38 = vcombine.low %v1356_v33, %v1370_v36  ;;  %v1379_v39 = vcombine.high %v1356_v33, %v1370_v36  ;;  %v1380_v40 = vcombine.low %v1363_v34, %v1377_v37 }
 0x20c   :  { %v1381_v41 = vcombine.high %v1363_v34, %v1377_v37 }
 0x20d   :  { %1407 = vst [vmem:[#allocation2 + $0x48] sm:$0xff] %v1378_v38  ;;  %1409 = vst [vmem:[#allocation2 + $0x58] sm:$0xff] %v1379_v39 }
 0x20e   :  { %1411 = vst [vmem:[#allocation2 + $0x68] sm:$0xff] %v1380_v40  ;;  %1413 = vst [vmem:[#allocation2 + $0x78] sm:$0xff] %v1381_v41 }
 0x20f   :  { %1418 = vsyncadd [#allocation3], 1792  ;;  %s1722_s4 = smov [#allocation2]  }
 0x210   :  { %s1419_s8 = sshll.u32 %s1722_s4, 4  ;;  %s1420_s8 = int_to_ptr.vmem [resolvable:$true] %s1419_s8 }
 0x211   :  { %s1696_s9 = scalar_lea.vmem %s1420_s8, 256  ;;  %s1700_s10 = scalar_lea.vmem %s1420_s8, 2048 }
 0x212   :  { %p1697_p0 = scmp.ne.s32.totalorder %s1420_s8, %s1696_s9  ;;  %p1701_p1 = scmp.lt.s32.totalorder %s1420_s8, %s1420_s8 }
 0x213   :  { %p1702_p2 = scmp.lt.s32.totalorder %s1700_s10, %s1696_s9 }
 0x215   :  { %p1703_p3 = por %p1702_p2, %p1701_p1 }
 0x217   :  { %p1704_p4 = pnand %p1703_p3, %p1697_p0 }
 0x219   :  { %1707 = shalt.err (!%p1704_p4)
}
 0x21a   :  { %s1708_s13 = scalar_lea.hbm %s2115_s5, 256 }
 0x21b   :  { %p1709_p5 = scmp.ne.s32.totalorder %s2115_s5, %s1708_s13  ;;  %p1712_p6 = scmp.lt.u32.totalorder %s1708_s13, %s2115_s5 }
 0x21d   :  { %p1714_p7 = pnand %p1712_p6, %p1709_p5 }
 0x21f   :  { %1717 = shalt.err (!%p1714_p7)
}
 0x220   :  { %s1723_s18 = smov 256   ;;  %s1724_s19 = smov 16  }
 0x221   :  { %1425 = dma.vmem_to_hbm [thread:$0]  %s1420_s8, 256, %s2115_s5, [#allocation3], %s1723_s18, %s1723_s18, %s1724_s19  }
 0x222   :  { %1718 = dma.done.wait [#allocation3], 2048  }
 0x223   :  { %1719 = vsyncadd [#allocation3], 4294965248 }
 0x224   :  { %1429 = vsyncpa [#allocation3], 1 }

</bundles_post_ra>
